<compile_context>
chip_gen: v5e
topology: v5e:2x2
jax: 0.10.0
libtpu: 0.0.40
codegen_flags: <defaults>
</compile_context>

<pallas_src>
import functools

import jax
import jax.numpy as jnp
from jax.experimental import pallas as pl
from jax.experimental.pallas import tpu as pltpu

TM, TN, TK = 256, 256, 256          # MXU-friendly GEMM tiles (bf16 operands)

CFG = ((64, 3, 1), (128, 4, 2), (256, 6, 2), (512, 3, 2))   # ResNet-50
LATENT_DIM = 64


def _round_up(x, m):
    return (x + m - 1) // m * m


# --------------------------------------------------------------------------
# Pallas kernels
# --------------------------------------------------------------------------

def _mm_affine_kernel(*refs, act, has_res):
    """Tiled bf16 GEMM, f32 accumulator, fused affine (+residual) + act."""
    if has_res:
        x_ref, w_ref, s_ref, b_ref, r_ref, o_ref, acc_ref = refs
    else:
        x_ref, w_ref, s_ref, b_ref, o_ref, acc_ref = refs
        r_ref = None
    k = pl.program_id(2)

    @pl.when(k == 0)
    def _():
        acc_ref[...] = jnp.zeros_like(acc_ref)

    acc_ref[...] += jnp.dot(x_ref[...], w_ref[...],
                            preferred_element_type=jnp.float32)

    @pl.when(k == pl.num_programs(2) - 1)
    def _():
        y = acc_ref[...] * s_ref[...] + b_ref[...]
        if has_res:
            y = y + r_ref[...].astype(jnp.float32)
        if act == "relu":
            y = jnp.maximum(y, 0.0)
        o_ref[...] = y.astype(o_ref.dtype)


def _maxpool_kernel(x_ref, o_ref):
    x = x_ref[...]                       # (9, tm, C)  window dim outermost
    m = x[0]
    for i in range(1, x.shape[0]):
        m = jnp.maximum(m, x[i])
    o_ref[...] = m


def _gap_kernel(x_ref, o_ref):
    x = x_ref[...].astype(jnp.float32)   # (1, HW, C)
    o_ref[...] = jnp.mean(x, axis=1, keepdims=True)


def _reparam_kernel(mu_ref, lv_ref, eps_ref, z_ref):
    z_ref[...] = mu_ref[...] + jnp.exp(0.5 * lv_ref[...]) * eps_ref[...]


# --------------------------------------------------------------------------
# GEMM wrapper: out = act((x @ w) * scale + shift [+ residual])
# --------------------------------------------------------------------------

@functools.partial(jax.jit, static_argnames=("act", "out_dtype"))
def matmul_affine(x, w, scale, shift, residual=None, *, act="none",
                  out_dtype=jnp.float32):
    M, K = x.shape
    K2, N = w.shape
    assert K == K2
    x = x.astype(jnp.bfloat16)
    w = w.astype(jnp.bfloat16)
    scale = scale.reshape(1, N).astype(jnp.float32)
    shift = shift.reshape(1, N).astype(jnp.float32)

    tm = min(TM, _round_up(M, 8))
    tn = min(TN, _round_up(N, 128))
    tk = min(TK, _round_up(K, 128))
    Mp, Kp, Np = _round_up(M, tm), _round_up(K, tk), _round_up(N, tn)

    if (Mp, Kp) != (M, K):                     # skip pad copies when aligned
        x = jnp.pad(x, ((0, Mp - M), (0, Kp - K)))
    if (Kp, Np) != (K, N):
        w = jnp.pad(w, ((0, Kp - K), (0, Np - N)))
    if Np != N:
        scale = jnp.pad(scale, ((0, 0), (0, Np - N)))
        shift = jnp.pad(shift, ((0, 0), (0, Np - N)))

    operands = [x, w, scale, shift]
    in_specs = [
        pl.BlockSpec((tm, tk), lambda i, j, k: (i, k)),
        pl.BlockSpec((tk, tn), lambda i, j, k: (k, j)),
        pl.BlockSpec((1, tn), lambda i, j, k: (0, j)),
        pl.BlockSpec((1, tn), lambda i, j, k: (0, j)),
    ]
    has_res = residual is not None
    if has_res:
        r = residual.astype(jnp.bfloat16)
        if (Mp, Np) != (M, N):
            r = jnp.pad(r, ((0, Mp - M), (0, Np - N)))
        operands.append(r)
        in_specs.append(pl.BlockSpec((tm, tn), lambda i, j, k: (i, j)))

    grid = (Mp // tm, Np // tn, Kp // tk)
    out = pl.pallas_call(
        functools.partial(_mm_affine_kernel, act=act, has_res=has_res),
        out_shape=jax.ShapeDtypeStruct((Mp, Np), out_dtype),
        grid_spec=pltpu.PrefetchScalarGridSpec(
            num_scalar_prefetch=0,
            grid=grid,
            in_specs=in_specs,
            out_specs=pl.BlockSpec((tm, tn), lambda i, j, k: (i, j)),
            scratch_shapes=[pltpu.VMEM((tm, tn), jnp.float32)],
        ),
        compiler_params=pltpu.CompilerParams(
            dimension_semantics=("parallel", "parallel", "arbitrary")),
    )(*operands)
    if (Mp, Np) != (M, N):
        out = out[:M, :N]
    return out


# --------------------------------------------------------------------------
# Conv / pooling wrappers (glue in JAX, compute in Pallas)
# --------------------------------------------------------------------------

def _im2col(x, kh, kw, stride, pad):
    """NHWC -> (B*Ho*Wo, kh*kw*C) bf16 patches (feature order [dy, dx, c])."""
    B, H, W, C = x.shape
    xp = jnp.pad(x, ((0, 0), (pad, pad), (pad, pad), (0, 0)))
    Ho = (H + 2 * pad - kh) // stride + 1
    Wo = (W + 2 * pad - kw) // stride + 1
    cols = []
    for dy in range(kh):
        for dx in range(kw):
            cols.append(xp[:, dy:dy + stride * Ho:stride,
                           dx:dx + stride * Wo:stride, :])
    patches = jnp.concatenate(cols, axis=-1)          # (B, Ho, Wo, kh*kw*C)
    return patches.reshape(B * Ho * Wo, kh * kw * C), (B, Ho, Wo)


@functools.partial(jax.jit, static_argnames=("kh", "kw", "stride", "pad", "act"))
def conv_bn(x, wmat, scale, shift, residual=None, *, kh, kw, stride, pad, act):
    """Conv2d (no bias) + folded BatchNorm + act (+ fused residual add)."""
    B, H, W, Cin = x.shape
    if kh == 1 and kw == 1 and pad == 0:
        # 1x1 conv: no im2col -- plain (strided) reshape straight into the GEMM.
        if stride > 1:
            x = x[:, ::stride, ::stride, :]
        _, Ho, Wo, _ = x.shape
        cols = x.reshape(B * Ho * Wo, Cin)
    else:
        # TODO(synk): 3x3/7x7 convs still go through im2col (in bf16); a direct
        # shifted-window conv kernel would remove the remaining patch blow-up.
        cols, (B, Ho, Wo) = _im2col(x, kh, kw, stride, pad)
    Cout = wmat.shape[1]
    res = None if residual is None else residual.reshape(B * Ho * Wo, Cout)
    y = matmul_affine(cols, wmat, scale, shift, residual=res,
                      act=act, out_dtype=jnp.bfloat16)
    return y.reshape(B, Ho, Wo, Cout)


@jax.jit
def maxpool_3x3_s2(x):
    """MaxPool2d(kernel=3, stride=2, padding=1) on NHWC, tiled over M."""
    B, H, W, C = x.shape
    k, s, p = 3, 2, 1
    Ho = (H + 2 * p - k) // s + 1
    Wo = (W + 2 * p - k) // s + 1
    xp = jnp.pad(x, ((0, 0), (p, p), (p, p), (0, 0)),
                 constant_values=-jnp.inf)
    slabs = []
    for dy in range(k):
        for dx in range(k):
            slabs.append(
                xp[:, dy:dy + s * Ho:s, dx:dx + s * Wo:s, :]
                .reshape(B * Ho * Wo, C))
    stacked = jnp.stack(slabs, axis=0)               # (9, M, C) window outermost
    M = B * Ho * Wo
    tm = min(512, _round_up(M, 8))
    Mp = _round_up(M, tm)
    if Mp != M:
        stacked = jnp.pad(stacked, ((0, 0), (0, Mp - M), (0, 0)))
    out = pl.pallas_call(
        _maxpool_kernel,
        out_shape=jax.ShapeDtypeStruct((Mp, C), x.dtype),
        grid_spec=pltpu.PrefetchScalarGridSpec(
            num_scalar_prefetch=0,
            grid=(Mp // tm,),
            in_specs=[pl.BlockSpec((k * k, tm, C), lambda i: (0, i, 0))],
            out_specs=pl.BlockSpec((tm, C), lambda i: (i, 0)),
        ),
        compiler_params=pltpu.CompilerParams(dimension_semantics=("parallel",)),
    )(stacked)
    return out[:M].reshape(B, Ho, Wo, C)


@jax.jit
def global_avgpool(x):
    """AdaptiveAvgPool2d((1,1)) + flatten: NHWC -> (B, C) in f32."""
    B, H, W, C = x.shape
    xr = x.reshape(B, H * W, C)
    out = pl.pallas_call(
        _gap_kernel,
        out_shape=jax.ShapeDtypeStruct((B, 1, C), jnp.float32),
        grid_spec=pltpu.PrefetchScalarGridSpec(
            num_scalar_prefetch=0,
            grid=(B,),
            in_specs=[pl.BlockSpec((1, H * W, C), lambda b: (b, 0, 0))],
            out_specs=pl.BlockSpec((1, 1, C), lambda b: (b, 0, 0)),
        ),
        compiler_params=pltpu.CompilerParams(dimension_semantics=("parallel",)),
    )(xr)
    return out.reshape(B, C)


@jax.jit
def reparametrize(mu, logvar, eps):
    """z = mu + exp(0.5*logvar) * eps   (eps ~ U[0,1), per torch.rand_like)."""
    return pl.pallas_call(
        _reparam_kernel,
        out_shape=jax.ShapeDtypeStruct(mu.shape, jnp.float32),
    )(mu, logvar, eps)


# --------------------------------------------------------------------------
# Deterministic parameter construction (synthetic stand-in for pretrained)
# Weights are pre-folded into lane-dense (K, N) bf16 GEMM matrices.
# --------------------------------------------------------------------------

class ParamGen:
    def __init__(self, seed=0):
        self.key = jax.random.PRNGKey(seed)

    def _normal(self, shape):
        self.key, sub = jax.random.split(self.key)
        return jax.random.normal(sub, shape, jnp.float32)

    def conv_mat(self, cin, cout, kh, kw):
        fan_in = cin * kh * kw
        w = self._normal((fan_in, cout)) * (2.0 / fan_in) ** 0.5
        return w.astype(jnp.bfloat16)                 # already (K, N) layout

    def linear(self, cout, cin):
        w = self._normal((cout, cin)) * (1.0 / cin) ** 0.5
        b = 0.05 * self._normal((cout,))
        return w, b

    def bn(self, c):
        gamma = 1.0 + 0.1 * self._normal((c,))
        beta = 0.1 * self._normal((c,))
        mean = 0.1 * self._normal((c,))
        var = jnp.abs(1.0 + 0.1 * self._normal((c,))) + 0.1
        scale = (gamma / jnp.sqrt(var + 1e-5)).astype(jnp.float32)
        shift = (beta - mean * scale).astype(jnp.float32)
        return scale, shift


def build_params(latent_dim=LATENT_DIM):
    pg = ParamGen(0)
    P = {"latent_dim": latent_dim}
    P["conv1_w"] = pg.conv_mat(3, 64, 7, 7)
    P["bn1"] = pg.bn(64)
    in_c = 64
    layers = []
    for width, nblocks, _ in CFG:
        blocks = []
        for b in range(nblocks):
            p = {}
            p["w1"] = pg.conv_mat(in_c, width, 1, 1)
            p["s1"], p["b1"] = pg.bn(width)
            p["w2"] = pg.conv_mat(width, width, 3, 3)
            p["s2"], p["b2"] = pg.bn(width)
            p["w3"] = pg.conv_mat(width, 4 * width, 1, 1)
            p["s3"], p["b3"] = pg.bn(4 * width)
            if b == 0:                                 # projection shortcut
                p["wd"] = pg.conv_mat(in_c, 4 * width, 1, 1)
                p["sd"], p["bd"] = pg.bn(4 * width)
            blocks.append(p)
            in_c = 4 * width
        layers.append(blocks)
    P["layers"] = layers
    # fc1 (mu) and fc2 (logvar) fused into a single (2048, 2*latent) GEMM.
    w1, b1 = pg.linear(latent_dim, 2048)
    w2, b2 = pg.linear(latent_dim, 2048)
    P["head_w"] = jnp.concatenate([w1.T, w2.T], axis=1).astype(jnp.bfloat16)
    P["head_b"] = jnp.concatenate([b1, b2]).astype(jnp.float32)
    P["head_s"] = jnp.ones((2 * latent_dim,), jnp.float32)
    # Note: self.fc (2048 -> 1) of the PyTorch module is unused in forward().
    return P


# --------------------------------------------------------------------------
# Forward pass (matches ResnetEncoder.forward)
# --------------------------------------------------------------------------

def bottleneck(x, p, stride):
    out = conv_bn(x, p["w1"], p["s1"], p["b1"],
                  kh=1, kw=1, stride=1, pad=0, act="relu")
    out = conv_bn(out, p["w2"], p["s2"], p["b2"],
                  kh=3, kw=3, stride=stride, pad=1, act="relu")
    if "wd" in p:
        identity = conv_bn(x, p["wd"], p["sd"], p["bd"],
                           kh=1, kw=1, stride=stride, pad=0, act="none")
    else:
        identity = x
    # conv3 + bn3 + residual add + ReLU, all fused in one GEMM epilogue.
    return conv_bn(out, p["w3"], p["s3"], p["b3"], residual=identity,
                   kh=1, kw=1, stride=1, pad=0, act="relu")


def forward(params, x_nchw, eps):
    x = jnp.transpose(x_nchw, (0, 2, 3, 1)).astype(jnp.bfloat16)  # NCHW -> NHWC
    s1, b1 = params["bn1"]
    x = conv_bn(x, params["conv1_w"], s1, b1,
                kh=7, kw=7, stride=2, pad=3, act="relu")
    x = maxpool_3x3_s2(x)
    for blocks, (_, _, stride0) in zip(params["layers"], CFG):
        for bi, blk in enumerate(blocks):
            x = bottleneck(x, blk, stride0 if bi == 0 else 1)
    rep = global_avgpool(x)                                   # (B, 2048) f32
    head = matmul_affine(rep, params["head_w"], params["head_s"],
                         params["head_b"], act="none",
                         out_dtype=jnp.float32)               # (B, 2*latent)
    L = params["latent_dim"]
    mu, logvar = head[:, :L], head[:, L:]
    z = reparametrize(mu, logvar, eps)                        # single-sample path
    return z, mu, logvar


# TODO(synk): BatchNorm layers use folded running statistics (inference mode);
# training-mode batch statistics are not reproduced.

if __name__ == "__main__":
    key = jax.random.PRNGKey(0)
    kx, ke = jax.random.split(key)
    x = jax.random.normal(kx, (2, 3, 64, 64), jnp.float32)    # NCHW like PyTorch
    eps = jax.random.uniform(ke, (2, LATENT_DIM), jnp.float32)  # torch.rand_like
    params = build_params()
    z, mu, logvar = forward(params, x, eps)
    z = jax.block_until_ready(z)
    assert z.shape == (2, LATENT_DIM)
    assert mu.shape == (2, LATENT_DIM) and logvar.shape == (2, LATENT_DIM)
    assert bool(jnp.all(jnp.isfinite(mu)))
    assert bool(jnp.all(jnp.isfinite(logvar)))
    print("KERNEL_OK")
</pallas_src>

<mosaic_0001>
module attributes {stable_mosaic.version = 11 : i64} {
  func.func @_mm_affine_kernel(%arg0: i32, %arg1: i32, %arg2: i32, %arg3: memref<256x256xbf16, #tpu.memory_space<vmem>>, %arg4: memref<256x128xbf16, #tpu.memory_space<vmem>>, %arg5: memref<1x128xf32, #tpu.memory_space<vmem>>, %arg6: memref<1x128xf32, #tpu.memory_space<vmem>>, %arg7: memref<256x128xbf16, #tpu.memory_space<vmem>>, %arg8: memref<256x128xf32, #tpu.memory_space<vmem>>) attributes {dimension_semantics = [#tpu.dimension_semantics<parallel>, #tpu.dimension_semantics<parallel>, #tpu.dimension_semantics<arbitrary>], iteration_bounds = array<i64: 8, 1, 1>, scalar_prefetch = 0 : i64, scratch_operands = 1 : i64, tpu.core_type = #tpu.core_type<tc>, window_params = [{transform_indices = @transform_0, window_bounds = array<i64: 256, 256>}, {transform_indices = @transform_1, window_bounds = array<i64: 256, 128>}, {transform_indices = @transform_2, window_bounds = array<i64: 1, 128>}, {transform_indices = @transform_3, window_bounds = array<i64: 1, 128>}, {transform_indices = @transform_4, window_bounds = array<i64: 256, 128>}]} {
    %c0_i32 = arith.constant 0 : i32
    %0 = arith.cmpi eq, %arg2, %c0_i32 : i32
    %1 = arith.extui %0 : i1 to i32
    %c0_i32_0 = arith.constant 0 : i32
    %2 = arith.cmpi ne, %1, %c0_i32_0 : i32
    scf.if %2 {
      %cst_10 = arith.constant 0.000000e+00 : f32
      %12 = vector.broadcast %cst_10 : f32 to vector<256x128xf32>
      %c0_11 = arith.constant 0 : index
      %c0_12 = arith.constant 0 : index
      %13 = vector.load %arg8[%c0_11, %c0_12] : memref<256x128xf32, #tpu.memory_space<vmem>>, vector<256x128xf32>
      tpu.vector_store %arg8[%c0_11, %c0_12], %12 {strides = array<i32>} : memref<256x128xf32, #tpu.memory_space<vmem>>, vector<256x128xf32>,
    } else {
    }
    %c0 = arith.constant 0 : index
    %c0_1 = arith.constant 0 : index
    %3 = vector.load %arg8[%c0, %c0_1] : memref<256x128xf32, #tpu.memory_space<vmem>>, vector<256x128xf32>
    %c0_2 = arith.constant 0 : index
    %c0_3 = arith.constant 0 : index
    %4 = vector.load %arg3[%c0_2, %c0_3] : memref<256x256xbf16, #tpu.memory_space<vmem>>, vector<256x256xbf16>
    %c0_4 = arith.constant 0 : index
    %c0_5 = arith.constant 0 : index
    %5 = vector.load %arg4[%c0_4, %c0_5] : memref<256x128xbf16, #tpu.memory_space<vmem>>, vector<256x128xbf16>
    %cst = arith.constant dense<0.000000e+00> : vector<256x128xf32>
    %6 = tpu.matmul %4, %5, %cst {dimension_numbers = #tpu.dot_dimension_numbers<[1], [0], [0], [1], [0, 0, 1, 1], [], []>} : vector<256x256xbf16>, vector<256x128xbf16>, vector<256x128xf32> -> vector<256x128xf32>
    %7 = arith.addf %3, %6 : vector<256x128xf32>
    %c0_6 = arith.constant 0 : index
    %c0_7 = arith.constant 0 : index
    %8 = vector.load %arg8[%c0_6, %c0_7] : memref<256x128xf32, #tpu.memory_space<vmem>>, vector<256x128xf32>
    tpu.vector_store %arg8[%c0_6, %c0_7], %7 {strides = array<i32>} : memref<256x128xf32, #tpu.memory_space<vmem>>, vector<256x128xf32>,
    %c0_i32_8 = arith.constant 0 : i32
    %9 = arith.cmpi eq, %arg2, %c0_i32_8 : i32
    %10 = arith.extui %9 : i1 to i32
    %c0_i32_9 = arith.constant 0 : i32
    %11 = arith.cmpi ne, %10, %c0_i32_9 : i32
    scf.if %11 {
      %c0_10 = arith.constant 0 : index
      %c0_11 = arith.constant 0 : index
      %12 = vector.load %arg8[%c0_10, %c0_11] : memref<256x128xf32, #tpu.memory_space<vmem>>, vector<256x128xf32>
      %c0_12 = arith.constant 0 : index
      %c0_13 = arith.constant 0 : index
      %13 = vector.load %arg5[%c0_12, %c0_13] : memref<1x128xf32, #tpu.memory_space<vmem>>, vector<1x128xf32>
      %14 = vector.broadcast %13 : vector<1x128xf32> to vector<256x128xf32>
      %15 = arith.mulf %12, %14 : vector<256x128xf32>
      %c0_14 = arith.constant 0 : index
      %c0_15 = arith.constant 0 : index
      %16 = vector.load %arg6[%c0_14, %c0_15] : memref<1x128xf32, #tpu.memory_space<vmem>>, vector<1x128xf32>
      %17 = vector.broadcast %16 : vector<1x128xf32> to vector<256x128xf32>
      %18 = arith.addf %15, %17 : vector<256x128xf32>
      %cst_16 = arith.constant 0.000000e+00 : f32
      %19 = vector.broadcast %cst_16 : f32 to vector<256x128xf32>
      %20 = arith.maximumf %18, %19 : vector<256x128xf32>
      %21 = arith.truncf %20 : vector<256x128xf32> to vector<256x128xbf16>
      %c0_17 = arith.constant 0 : index
      %c0_18 = arith.constant 0 : index
      %22 = vector.load %arg7[%c0_17, %c0_18] : memref<256x128xbf16, #tpu.memory_space<vmem>>, vector<256x128xbf16>
      tpu.vector_store %arg7[%c0_17, %c0_18], %21 {strides = array<i32>} : memref<256x128xbf16, #tpu.memory_space<vmem>>, vector<256x128xbf16>,
    } else {
    }
    return
  }
  func.func @transform_0(%arg0: i32, %arg1: i32, %arg2: i32) -> (i32, i32) {
    %c0_i32 = arith.constant 0 : i32
    return %arg0, %arg2 : i32, i32
  }
  func.func @transform_1(%arg0: i32, %arg1: i32, %arg2: i32) -> (i32, i32) {
    %c0_i32 = arith.constant 0 : i32
    return %arg2, %arg1 : i32, i32
  }
  func.func @transform_2(%arg0: i32, %arg1: i32, %arg2: i32) -> (i32, i32) {
    %c0_i32 = arith.constant 0 : i32
    %c0_i32_0 = arith.constant 0 : i32
    return %c0_i32, %arg1 : i32, i32
  }
  func.func @transform_3(%arg0: i32, %arg1: i32, %arg2: i32) -> (i32, i32) {
    %c0_i32 = arith.constant 0 : i32
    %c0_i32_0 = arith.constant 0 : i32
    return %c0_i32, %arg1 : i32, i32
  }
  func.func @transform_4(%arg0: i32, %arg1: i32, %arg2: i32) -> (i32, i32) {
    %c0_i32 = arith.constant 0 : i32
    return %arg0, %arg1 : i32, i32
  }
}

</mosaic_0001>

<bundles_post_ra>
// kernel: matmul_affine.1
= control target key start
LH: loop header
LB: loop body
LE: loop exit
PB: predicated region body
PF: predicated region fallthrough
CT: control target
= control target key end

     0   :  { %s1709_s15 = smov 0   ;;  %s1711_s16 = smov 0   ;;  %s1955_s0 = inlined_call_operand.vmem [shape: bf16[2048,256], index: 0, kind: input, shape index: {}]   ;;  %s1956_s1 = inlined_call_operand.vmem [shape: bf16[256,128], index: 1, kind: input, shape index: {}]   ;;  %s1957_s2 = inlined_call_operand.vmem [shape: f32[1,128], index: 2, kind: input, shape index: {}]   ;;  %s1958_s3 = inlined_call_operand.vmem [shape: f32[1,128], index: 3, kind: input, shape index: {}]   ;;  %s1959_s4 = inlined_call_operand.vmem [shape: bf16[2048,128], index: 4, kind: output, shape index: {}]  }
   0x1   :  { %s1713_s17 = smov 0  }
   0x2 LB: > { %s33_s18 = sadd.s32 1, %s1678_s16  ;;  %p1274_p0 = scmp.ge.s32.totalorder %s1682_s17, 1  ;;  %s1682_s17 = sphi %s1713_s17, %s14_s17   ;;  %s1678_s16 = sphi %s1711_s16, %s1961_s16   ;;  %s1674_s15 = sphi %s1709_s15, %s1960_s15  }
   0x3   : > { %p35_p1 = scmp.ge.s32.totalorder %s33_s18, 8  ;;  %p224_p2 = scmp.lt.s32.totalorder %s1682_s17, 9 }
   0x5   : > { %s1963_s18 = smov (%p35_p1, %s33_s18), 0  ;;  %p225_p3 = pnand %p1274_p0, %p224_p2 }
   0x6   : > { %s1275_s5 = sshll.u32 (!%p225_p3), %s1674_s15, 5 }
   0x7   : > { %228 = sbr.rel (%p225_p3) target bundleno = 308 (0x134), region = 36  ;;  %p274_p4 = scmp.lt.s32.totalorder (!%p225_p3), %s1275_s5, 255 }
   0xc   : > { %v1514_v0 = vld [vmem:[%s1956_s1 + $0x38] sm:$0xff]  ;;  %v1513_v2 = vld [vmem:[%s1956_s1 + $0x30] sm:$0xff]  ;;  %v1512_v4 = vld [vmem:[%s1956_s1 + $0x28] sm:$0xff]  ;;  %s1965_s5 = smov (!%p274_p4, %s1275_s5), 255 }
   0xd   : > { %v1522_v1 = vld [vmem:[%s1956_s1 + $0x78] sm:$0xff]  ;;  %696 = vmatpush.bf16.msra.mxu0 %v1514_v0  ;;  %1618 = vmatpush.bf16.msra.mxu2 %v1514_v0  ;;  %v1521_v3 = vld [vmem:[%s1956_s1 + $0x70] sm:$0xff]  ;;  %v1520_v5 = vld [vmem:[%s1956_s1 + $0x68] sm:$0xff]  ;;  %s1474_s21 = sshll.u32 %s1965_s5, 3  ;;  %s1279_s12 = sshll.u32 %s1965_s5, 2 }
   0xe   : > { %785 = vmatpush.bf16.msra.mxu1 %v1522_v1  ;;  %1626 = vmatpush.bf16.msra.mxu3 %v1522_v1  ;;  %v1511_v6 = vld [vmem:[%s1956_s1 + $0x20] sm:$0xff]  ;;  %v1510_v8 = vld [vmem:[%s1956_s1 + $0x18] sm:$0xff]  ;;  %v1509_v10 = vld [vmem:[%s1956_s1 + $0x10] sm:$0xff]  ;;  %s1775_s26 = scalar_lea.vmem %s1955_s0, %s1474_s21  ;;  %s1869_s15 = scalar_lea.vmem %s1959_s4, %s1279_s12 }
   0xf   : > { %v1519_v7 = vld [vmem:[%s1956_s1 + $0x60] sm:$0xff]  ;;  %v1518_v9 = vld [vmem:[%s1956_s1 + $0x58] sm:$0xff]  ;;  %v1517_v11 = vld [vmem:[%s1956_s1 + $0x50] sm:$0xff] }
  0x10   : > { %v1508_v12 = vld [vmem:[%s1956_s1 + $0x8] sm:$0xff]  ;;  %v1507_v14 = vld [vmem:[%s1956_s1] sm:$0xff]  ;;  %v1290_v28 = vld [vmem:[%s1775_s26 + $0x10] sm:$0xf] }
  0x11   : > { %697 = vmatpush.bf16.msra.mxu0 %v1513_v2  ;;  %1619 = vmatpush.bf16.msra.mxu2 %v1513_v2  ;;  %v1516_v13 = vld [vmem:[%s1956_s1 + $0x48] sm:$0xff]  ;;  %v1515_v15 = vld [vmem:[%s1956_s1 + $0x40] sm:$0xff]  ;;  %v1478_v29 = vld [vmem:[%s1775_s26 + $0x14] sm:$0xf0] }
  0x12   : > { %786 = vmatpush.bf16.msra.mxu1 %v1521_v3  ;;  %1627 = vmatpush.bf16.msra.mxu3 %v1521_v3  ;;  %v1282_v16 = vld [vmem:[%s1775_s26] sm:$0xf]  ;;  %v1476_v17 = vld [vmem:[%s1775_s26 + $0x4] sm:$0xf0]  ;;  %v1475_v20 = vld [vmem:[%s1775_s26 + $0x4] sm:$0xf]  ;;  %v1291_v36 = vor.u32 %v1478_v29, %v1290_v28 }
  0x13   : > { %v1346_v18 = vld [vmem:[%s1775_s26 + $0x80] sm:$0xf]  ;;  %v1492_v19 = vld [vmem:[%s1775_s26 + $0x84] sm:$0xf0]  ;;  %v1284_v21 = vld [vmem:[%s1775_s26 + $0x8] sm:$0xf0]  ;;  %v1283_v24 = vor.u32 %v1476_v17, %v1282_v16 }
  0x14   : > { %v1491_v22 = vld [vmem:[%s1775_s26 + $0x84] sm:$0xf]  ;;  %v1348_v23 = vld [vmem:[%s1775_s26 + $0x88] sm:$0xf0]  ;;  %v1347_v25 = vor.u32 %v1492_v19, %v1346_v18  ;;  %v1287_v26 = vor.u32 %v1475_v20, %v1284_v21  ;;  %v1354_v30 = vld [vmem:[%s1775_s26 + $0x90] sm:$0xf] }
  0x15   : > { %698 = vmatpush.bf16.msra.mxu0 %v1512_v4  ;;  %1620 = vmatpush.bf16.msra.mxu2 %v1512_v4  ;;  %v1351_v27 = vor.u32 %v1491_v22, %v1348_v23  ;;  %v1494_v31 = vld [vmem:[%s1775_s26 + $0x94] sm:$0xf0]  ;;  %v1477_v32 = vld [vmem:[%s1775_s26 + $0x14] sm:$0xf]  ;;  %v1292_v33 = vld [vmem:[%s1775_s26 + $0x18] sm:$0xf0] }
  0x16   : > { %787 = vmatpush.bf16.msra.mxu1 %v1520_v5  ;;  %1628 = vmatpush.bf16.msra.mxu3 %v1520_v5  ;;  %v1493_v34 = vld [vmem:[%s1775_s26 + $0x94] sm:$0xf]  ;;  %v1356_v35 = vld [vmem:[%s1775_s26 + $0x98] sm:$0xf0]  ;;  %v1355_v37 = vor.u32 %v1494_v31, %v1354_v30  ;;  %v1295_v38 = vor.u32 %v1477_v32, %v1292_v33  ;;  %v1298_v40 = vld [vmem:[%s1775_s26 + $0x20] sm:$0xf] }
  0x17   : > { %v1359_v39 = vor.u32 %v1493_v34, %v1356_v35  ;;  %v1480_v41 = vld [vmem:[%s1775_s26 + $0x24] sm:$0xf0]  ;;  %v1362_v42 = vld [vmem:[%s1775_s26 + $0xa0] sm:$0xf]  ;;  %v1479_v44 = vld [vmem:[%s1775_s26 + $0x24] sm:$0xf] }
  0x18   : > { %v1496_v43 = vld [vmem:[%s1775_s26 + $0xa4] sm:$0xf0]  ;;  %v1300_v45 = vld [vmem:[%s1775_s26 + $0x28] sm:$0xf0]  ;;  %v1495_v46 = vld [vmem:[%s1775_s26 + $0xa4] sm:$0xf]  ;;  %v1299_v48 = vor.u32 %v1480_v41, %v1298_v40 }
  0x19   : > { %699 = vmatpush.bf16.msra.mxu0 %v1511_v6  ;;  %1621 = vmatpush.bf16.msra.mxu2 %v1511_v6  ;;  %v1364_v47 = vld [vmem:[%s1775_s26 + $0xa8] sm:$0xf0]  ;;  %v1363_v49 = vor.u32 %v1496_v43, %v1362_v42  ;;  %v1303_v50 = vor.u32 %v1479_v44, %v1300_v45  ;;  %v1306_v52 = vld [vmem:[%s1775_s26 + $0x30] sm:$0xf]  ;;  %v1482_v53 = vld [vmem:[%s1775_s26 + $0x34] sm:$0xf0] }
  0x1a   : > { %788 = vmatpush.bf16.msra.mxu1 %v1519_v7  ;;  %1629 = vmatpush.bf16.msra.mxu3 %v1519_v7  ;;  %v1367_v51 = vor.u32 %v1495_v46, %v1364_v47  ;;  %v1370_v54 = vld [vmem:[%s1775_s26 + $0xb0] sm:$0xf]  ;;  %v1498_v55 = vld [vmem:[%s1775_s26 + $0xb4] sm:$0xf0]  ;;  %v1481_v56 = vld [vmem:[%s1775_s26 + $0x34] sm:$0xf]  ;;  %v1307_v60 = vor.u32 %v1482_v53, %v1306_v52 }
  0x1b   : > { %v1308_v57 = vld [vmem:[%s1775_s26 + $0x38] sm:$0xf0]  ;;  %v1497_v58 = vld [vmem:[%s1775_s26 + $0xb4] sm:$0xf]  ;;  %v1371_v61 = vor.u32 %v1498_v55, %v1370_v54  ;;  %v1314_v0 = vld [vmem:[%s1775_s26 + $0x40] sm:$0xf] }
  0x1c   : > { %v1372_v59 = vld [vmem:[%s1775_s26 + $0xb8] sm:$0xf0]  ;;  %v1311_v62 = vor.u32 %v1481_v56, %v1308_v57  ;;  %v1484_v1 = vld [vmem:[%s1775_s26 + $0x44] sm:$0xf0]  ;;  %v1378_v2 = vld [vmem:[%s1775_s26 + $0xc0] sm:$0xf] }
  0x1d   : > { %700 = vmatpush.bf16.msra.mxu0 %v1510_v8  ;;  %1622 = vmatpush.bf16.msra.mxu2 %v1510_v8  ;;  %v1375_v63 = vor.u32 %v1497_v58, %v1372_v59  ;;  %v1500_v3 = vld [vmem:[%s1775_s26 + $0xc4] sm:$0xf0]  ;;  %v1483_v4 = vld [vmem:[%s1775_s26 + $0x44] sm:$0xf]  ;;  %v1316_v5 = vld [vmem:[%s1775_s26 + $0x48] sm:$0xf0]  ;;  %v1315_v8 = vor.u32 %v1484_v1, %v1314_v0 }
  0x1e   : > { %789 = vmatpush.bf16.msra.mxu1 %v1518_v9  ;;  %1630 = vmatpush.bf16.msra.mxu3 %v1518_v9  ;;  %v1499_v6 = vld [vmem:[%s1775_s26 + $0xc4] sm:$0xf]  ;;  %v1380_v7 = vld [vmem:[%s1775_s26 + $0xc8] sm:$0xf0]  ;;  %v1379_v9 = vor.u32 %v1500_v3, %v1378_v2  ;;  %v1485_v16 = vld [vmem:[%s1775_s26 + $0x54] sm:$0xf] }
  0x1f   : > { %v1324_v17 = vld [vmem:[%s1775_s26 + $0x58] sm:$0xf0]  ;;  %v1501_v18 = vld [vmem:[%s1775_s26 + $0xd4] sm:$0xf]  ;;  %v1487_v28 = vld [vmem:[%s1775_s26 + $0x64] sm:$0xf] }
  0x20   : > { %v1388_v19 = vld [vmem:[%s1775_s26 + $0xd8] sm:$0xf0]  ;;  %v1327_v22 = vor.u32 %v1485_v16, %v1324_v17  ;;  %v1332_v29 = vld [vmem:[%s1775_s26 + $0x68] sm:$0xf0]  ;;  %v1503_v30 = vld [vmem:[%s1775_s26 + $0xe4] sm:$0xf] }
  0x21   : > { %701 = vmatpush.bf16.msra.mxu0 %v1509_v10  ;;  %1623 = vmatpush.bf16.msra.mxu2 %v1509_v10  ;;  %v1319_v10 = vor.u32 %v1483_v4, %v1316_v5  ;;  %v1391_v23 = vor.u32 %v1501_v18, %v1388_v19  ;;  %v1396_v31 = vld [vmem:[%s1775_s26 + $0xe8] sm:$0xf0]  ;;  %v1335_v34 = vor.u32 %v1487_v28, %v1332_v29  ;;  %v1489_v40 = vld [vmem:[%s1775_s26 + $0x74] sm:$0xf]  ;;  %v1340_v41 = vld [vmem:[%s1775_s26 + $0x78] sm:$0xf0] }
  0x22   : > { %790 = vmatpush.bf16.msra.mxu1 %v1517_v11  ;;  %1631 = vmatpush.bf16.msra.mxu3 %v1517_v11  ;;  %v1383_v11 = vor.u32 %v1499_v6, %v1380_v7  ;;  %v1399_v35 = vor.u32 %v1503_v30, %v1396_v31  ;;  %v1505_v42 = vld [vmem:[%s1775_s26 + $0xf4] sm:$0xf]  ;;  %v1404_v43 = vld [vmem:[%s1775_s26 + $0xf8] sm:$0xf0]  ;;  %v1343_v46 = vor.u32 %v1489_v40, %v1340_v41  ;;  %v1859_v55 = vld [vmem:[%s1958_s3] ss:$0 sm:$0xff] }
  0x23   : > { %v1407_v47 = vor.u32 %v1505_v42, %v1404_v43 }
  0x25   : > { %702 = vmatpush.bf16.msra.mxu0 %v1508_v12  ;;  %1624 = vmatpush.bf16.msra.mxu2 %v1508_v12  ;;  %v1322_v12 = vld [vmem:[%s1775_s26 + $0x50] sm:$0xf] }
  0x26   : > { %791 = vmatpush.bf16.msra.mxu1 %v1516_v13  ;;  %1632 = vmatpush.bf16.msra.mxu3 %v1516_v13  ;;  %v1486_v13 = vld [vmem:[%s1775_s26 + $0x54] sm:$0xf0] }
  0x27   : > { %v1323_v20 = vor.u32 %v1486_v13, %v1322_v12 }
  0x29   : > { %703 = vmatpush.bf16.msra.mxu0 %v1507_v14  ;;  %1625 = vmatpush.bf16.msra.mxu2 %v1507_v14  ;;  %v1386_v14 = vld [vmem:[%s1775_s26 + $0xd0] sm:$0xf] }
  0x2a   : > { %792 = vmatpush.bf16.msra.mxu1 %v1515_v15  ;;  %1633 = vmatpush.bf16.msra.mxu3 %v1515_v15  ;;  %v1502_v15 = vld [vmem:[%s1775_s26 + $0xd4] sm:$0xf0] }
  0x2b   : > { %v1387_v21 = vor.u32 %v1502_v15, %v1386_v14 }
  0x2c   : > { %704 = vmatmul.bf16.vlgmr.msra.gmra.mxu0 %v1283_v24  ;;  %744 = vmatmul.bf16.vlgmr.msra.gmra.mxu2 %v1347_v25  ;;  %v1330_v24 = vld [vmem:[%s1775_s26 + $0x60] sm:$0xf]  ;;  %v1488_v25 = vld [vmem:[%s1775_s26 + $0x64] sm:$0xf0] }
  0x2d   : > { %793 = vmatmul.bf16.vlgmr.msra.gmra.mxu1 %v1287_v26  ;;  %833 = vmatmul.bf16.vlgmr.msra.gmra.mxu3 %v1351_v27  ;;  %v1394_v26 = vld [vmem:[%s1775_s26 + $0xe0] sm:$0xf]  ;;  %v1504_v27 = vld [vmem:[%s1775_s26 + $0xe4] sm:$0xf0]  ;;  %v1331_v32 = vor.u32 %v1488_v25, %v1330_v24 }
  0x2e   : > { %v1395_v33 = vor.u32 %v1504_v27, %v1394_v26 }
  0x3c   : > { %709 = vmatmul.bf16.gmra.mxu0 %v1291_v36  ;;  %749 = vmatmul.bf16.gmra.mxu2 %v1355_v37  ;;  %v1338_v36 = vld [vmem:[%s1775_s26 + $0x70] sm:$0xf]  ;;  %v1490_v37 = vld [vmem:[%s1775_s26 + $0x74] sm:$0xf0] }
  0x3d   : > { %798 = vmatmul.bf16.gmra.mxu1 %v1295_v38  ;;  %838 = vmatmul.bf16.gmra.mxu3 %v1359_v39  ;;  %v1402_v38 = vld [vmem:[%s1775_s26 + $0xf0] sm:$0xf]  ;;  %v1506_v39 = vld [vmem:[%s1775_s26 + $0xf4] sm:$0xf0]  ;;  %v1339_v44 = vor.u32 %v1490_v37, %v1338_v36 }
  0x3e   : > { %v1403_v45 = vor.u32 %v1506_v39, %v1402_v38 }
  0x4c   : > { %714 = vmatmul.bf16.gmra.mxu0 %v1299_v48  ;;  %754 = vmatmul.bf16.gmra.mxu2 %v1363_v49 }
  0x4d   : > { %803 = vmatmul.bf16.gmra.mxu1 %v1303_v50  ;;  %843 = vmatmul.bf16.gmra.mxu3 %v1367_v51  ;;  %v1853_v51 = vld [vmem:[%s1957_s2] ss:$0 sm:$0xff] }
  0x5c   : > { %719 = vmatmul.bf16.gmra.mxu0 %v1307_v60  ;;  %759 = vmatmul.bf16.gmra.mxu2 %v1371_v61 }
  0x5d   : > { %808 = vmatmul.bf16.gmra.mxu1 %v1311_v62  ;;  %848 = vmatmul.bf16.gmra.mxu3 %v1375_v63 }
  0x6c   : > { %724 = vmatmul.bf16.gmra.mxu0 %v1315_v8  ;;  %764 = vmatmul.bf16.gmra.mxu2 %v1379_v9 }
  0x6d   : > { %813 = vmatmul.bf16.gmra.mxu1 %v1319_v10  ;;  %853 = vmatmul.bf16.gmra.mxu3 %v1383_v11 }
  0x7c   : > { %729 = vmatmul.bf16.gmra.mxu0 %v1323_v20  ;;  %769 = vmatmul.bf16.gmra.mxu2 %v1387_v21 }
  0x7d   : > { %818 = vmatmul.bf16.gmra.mxu1 %v1327_v22  ;;  %858 = vmatmul.bf16.gmra.mxu3 %v1391_v23 }
  0x8c   : > { %734 = vmatmul.bf16.gmra.mxu0 %v1331_v32  ;;  %774 = vmatmul.bf16.gmra.mxu2 %v1395_v33 }
  0x8d   : > { %823 = vmatmul.bf16.gmra.mxu1 %v1335_v34  ;;  %863 = vmatmul.bf16.gmra.mxu3 %v1399_v35 }
  0x9c   : > { %739 = vmatmul.bf16.gmra.mxu0 %v1339_v44  ;;  %779 = vmatmul.bf16.gmra.mxu2 %v1403_v45 }
  0x9d   : > { %828 = vmatmul.bf16.gmra.mxu1 %v1343_v46  ;;  %868 = vmatmul.bf16.gmra.mxu3 %v1407_v47 }
  0xa9   : > { %v705_v48 = vpop.f32.mrf.mxu0 }
  0xaa   : > { %v794_v49 = vpop.f32.mrf.mxu1 }
  0xab   : > { %v795_v50 = vadd.f32 %v794_v49, %v705_v48 }
  0xad   : > { %v977_v54 = vmul.f32 %v1853_v51, %v795_v50 }
  0xaf   : > { %v745_v52 = vpop.f32.mrf.mxu2  ;;  %v1013_v60 = vadd.f32 %v1859_v55, %v977_v54 }
  0xb0   : > { %v834_v53 = vpop.f32.mrf.mxu3 }
  0xb1   : > { %v707_v56 = vpop.f32.mrf.mxu0  ;;  %v835_v58 = vadd.f32 %v834_v53, %v745_v52  ;;  %v1045_v2 = vmax.f32 %v1013_v60, 0.0 }
  0xb2   : > { %v796_v57 = vpop.f32.mrf.mxu1 }
  0xb3   : > { %v797_v59 = vadd.f32 %v796_v57, %v707_v56  ;;  %v993_v62 = vmul.f32 %v1853_v51, %v835_v58 }
  0xb5   : > { %v978_v61 = vmul.f32 %v1853_v51, %v797_v59  ;;  %v1029_v7 = vadd.f32 %v1859_v55, %v993_v62 }
  0xb7   : > { %v1014_v63 = vadd.f32 %v1859_v55, %v978_v61  ;;  %v747_v0 = vpop.f32.mrf.mxu2  ;;  %v1061_v12 = vmax.f32 %v1029_v7, 0.0 }
  0xb8   : > { %v836_v1 = vpop.f32.mrf.mxu3 }
  0xb9   : > { %v1046_v3 = vmax.f32 %v1014_v63, 0.0  ;;  %v837_v4 = vadd.f32 %v836_v1, %v747_v0  ;;  %v710_v5 = vpop.f32.mrf.mxu0 }
  0xba   : > { %v799_v6 = vpop.f32.mrf.mxu1 }
  0xbb   : > { %v1526_v8 = vpack.c.bf16 %v1046_v3, %v1045_v2  ;;  %v994_v9 = vmul.f32 %v1853_v51, %v837_v4  ;;  %v800_v11 = vadd.f32 %v799_v6, %v710_v5 }
  0xbd   : > { %1527 = vst [vmem:[%s1869_s15] sm:$0xff] %v1526_v8   ;;  %v1030_v10 = vadd.f32 %v1859_v55, %v994_v9  ;;  %v979_v17 = vmul.f32 %v1853_v51, %v800_v11 }
  0xbf   : > { %v1062_v13 = vmax.f32 %v1030_v10, 0.0  ;;  %v750_v14 = vpop.f32.mrf.mxu2  ;;  %v1015_v22 = vadd.f32 %v1859_v55, %v979_v17 }
  0xc0   : > { %v839_v15 = vpop.f32.mrf.mxu3 }
  0xc1   : > { %v1566_v16 = vpack.c.bf16 %v1062_v13, %v1061_v12  ;;  %v712_v18 = vpop.f32.mrf.mxu0  ;;  %v840_v20 = vadd.f32 %v839_v15, %v750_v14  ;;  %v1047_v28 = vmax.f32 %v1015_v22, 0.0 }
  0xc2   : > { %v801_v19 = vpop.f32.mrf.mxu1 }
  0xc3   : > { %1610 = vst [vmem:[%s1869_s15 + $0x40] sm:$0xff] %v1566_v16   ;;  %v802_v21 = vadd.f32 %v801_v19, %v712_v18  ;;  %v995_v24 = vmul.f32 %v1853_v51, %v840_v20 }
  0xc5   : > { %v980_v23 = vmul.f32 %v1853_v51, %v802_v21  ;;  %v1031_v33 = vadd.f32 %v1859_v55, %v995_v24 }
  0xc7   : > { %v1016_v25 = vadd.f32 %v1859_v55, %v980_v23  ;;  %v752_v26 = vpop.f32.mrf.mxu2  ;;  %v1063_v38 = vmax.f32 %v1031_v33, 0.0 }
  0xc8   : > { %v841_v27 = vpop.f32.mrf.mxu3 }
  0xc9   : > { %v1048_v29 = vmax.f32 %v1016_v25, 0.0  ;;  %v842_v30 = vadd.f32 %v841_v27, %v752_v26  ;;  %v715_v31 = vpop.f32.mrf.mxu0 }
  0xca   : > { %v804_v32 = vpop.f32.mrf.mxu1 }
  0xcb   : > { %v1531_v34 = vpack.c.bf16 %v1048_v29, %v1047_v28  ;;  %v996_v35 = vmul.f32 %v1853_v51, %v842_v30  ;;  %v805_v37 = vadd.f32 %v804_v32, %v715_v31 }
  0xcd   : > { %1603 = vst [vmem:[%s1869_s15 + $0x8] sm:$0xff] %v1531_v34   ;;  %v1032_v36 = vadd.f32 %v1859_v55, %v996_v35  ;;  %v981_v43 = vmul.f32 %v1853_v51, %v805_v37 }
  0xcf   : > { %v1064_v39 = vmax.f32 %v1032_v36, 0.0  ;;  %v755_v40 = vpop.f32.mrf.mxu2  ;;  %v1017_v48 = vadd.f32 %v1859_v55, %v981_v43 }
  0xd0   : > { %v844_v41 = vpop.f32.mrf.mxu3 }
  0xd1   : > { %v1571_v42 = vpack.c.bf16 %v1064_v39, %v1063_v38  ;;  %v717_v44 = vpop.f32.mrf.mxu0  ;;  %v845_v46 = vadd.f32 %v844_v41, %v755_v40  ;;  %v1049_v56 = vmax.f32 %v1017_v48, 0.0 }
  0xd2   : > { %v806_v45 = vpop.f32.mrf.mxu1 }
  0xd3   : > { %1611 = vst [vmem:[%s1869_s15 + $0x48] sm:$0xff] %v1571_v42   ;;  %v807_v47 = vadd.f32 %v806_v45, %v717_v44  ;;  %v997_v50 = vmul.f32 %v1853_v51, %v845_v46 }
  0xd5   : > { %v982_v49 = vmul.f32 %v1853_v51, %v807_v47  ;;  %v1033_v61 = vadd.f32 %v1859_v55, %v997_v50 }
  0xd7   : > { %v1018_v52 = vadd.f32 %v1859_v55, %v982_v49  ;;  %v757_v53 = vpop.f32.mrf.mxu2  ;;  %v1065_v2 = vmax.f32 %v1033_v61, 0.0 }
  0xd8   : > { %v846_v54 = vpop.f32.mrf.mxu3 }
  0xd9   : > { %v1050_v57 = vmax.f32 %v1018_v52, 0.0  ;;  %v847_v58 = vadd.f32 %v846_v54, %v757_v53  ;;  %v720_v59 = vpop.f32.mrf.mxu0 }
  0xda   : > { %v809_v60 = vpop.f32.mrf.mxu1 }
  0xdb   : > { %v1536_v62 = vpack.c.bf16 %v1050_v57, %v1049_v56  ;;  %v998_v63 = vmul.f32 %v1853_v51, %v847_v58  ;;  %v810_v1 = vadd.f32 %v809_v60, %v720_v59 }
  0xdd   : > { %1604 = vst [vmem:[%s1869_s15 + $0x10] sm:$0xff] %v1536_v62   ;;  %v1034_v0 = vadd.f32 %v1859_v55, %v998_v63  ;;  %v983_v7 = vmul.f32 %v1853_v51, %v810_v1 }
  0xdf   : > { %v1066_v3 = vmax.f32 %v1034_v0, 0.0  ;;  %v760_v4 = vpop.f32.mrf.mxu2  ;;  %v1019_v12 = vadd.f32 %v1859_v55, %v983_v7 }
  0xe0   : > { %v849_v5 = vpop.f32.mrf.mxu3 }
  0xe1   : > { %v1576_v6 = vpack.c.bf16 %v1066_v3, %v1065_v2  ;;  %v722_v8 = vpop.f32.mrf.mxu0  ;;  %v850_v10 = vadd.f32 %v849_v5, %v760_v4  ;;  %v1051_v18 = vmax.f32 %v1019_v12, 0.0 }
  0xe2   : > { %v811_v9 = vpop.f32.mrf.mxu1 }
  0xe3   : > { %1612 = vst [vmem:[%s1869_s15 + $0x50] sm:$0xff] %v1576_v6   ;;  %v812_v11 = vadd.f32 %v811_v9, %v722_v8  ;;  %v999_v14 = vmul.f32 %v1853_v51, %v850_v10 }
  0xe5   : > { %v984_v13 = vmul.f32 %v1853_v51, %v812_v11  ;;  %v1035_v23 = vadd.f32 %v1859_v55, %v999_v14 }
  0xe7   : > { %v1020_v15 = vadd.f32 %v1859_v55, %v984_v13  ;;  %v762_v16 = vpop.f32.mrf.mxu2  ;;  %v1067_v28 = vmax.f32 %v1035_v23, 0.0 }
  0xe8   : > { %v851_v17 = vpop.f32.mrf.mxu3 }
  0xe9   : > { %v1052_v19 = vmax.f32 %v1020_v15, 0.0  ;;  %v852_v20 = vadd.f32 %v851_v17, %v762_v16  ;;  %v725_v21 = vpop.f32.mrf.mxu0 }
  0xea   : > { %v814_v22 = vpop.f32.mrf.mxu1 }
  0xeb   : > { %v1541_v24 = vpack.c.bf16 %v1052_v19, %v1051_v18  ;;  %v1000_v25 = vmul.f32 %v1853_v51, %v852_v20  ;;  %v815_v27 = vadd.f32 %v814_v22, %v725_v21 }
  0xed   : > { %1605 = vst [vmem:[%s1869_s15 + $0x18] sm:$0xff] %v1541_v24   ;;  %v1036_v26 = vadd.f32 %v1859_v55, %v1000_v25  ;;  %v985_v33 = vmul.f32 %v1853_v51, %v815_v27 }
  0xef   : > { %v1068_v29 = vmax.f32 %v1036_v26, 0.0  ;;  %v765_v30 = vpop.f32.mrf.mxu2  ;;  %v1021_v38 = vadd.f32 %v1859_v55, %v985_v33 }
  0xf0   : > { %v854_v31 = vpop.f32.mrf.mxu3 }
  0xf1   : > { %v1581_v32 = vpack.c.bf16 %v1068_v29, %v1067_v28  ;;  %v727_v34 = vpop.f32.mrf.mxu0  ;;  %v855_v36 = vadd.f32 %v854_v31, %v765_v30  ;;  %v1053_v44 = vmax.f32 %v1021_v38, 0.0 }
  0xf2   : > { %v816_v35 = vpop.f32.mrf.mxu1 }
  0xf3   : > { %1613 = vst [vmem:[%s1869_s15 + $0x58] sm:$0xff] %v1581_v32   ;;  %v817_v37 = vadd.f32 %v816_v35, %v727_v34  ;;  %v1001_v40 = vmul.f32 %v1853_v51, %v855_v36 }
  0xf5   : > { %v986_v39 = vmul.f32 %v1853_v51, %v817_v37  ;;  %v1037_v49 = vadd.f32 %v1859_v55, %v1001_v40 }
  0xf7   : > { %v1022_v41 = vadd.f32 %v1859_v55, %v986_v39  ;;  %v767_v42 = vpop.f32.mrf.mxu2  ;;  %v1069_v56 = vmax.f32 %v1037_v49, 0.0 }
  0xf8   : > { %v856_v43 = vpop.f32.mrf.mxu3 }
  0xf9   : > { %v1054_v45 = vmax.f32 %v1022_v41, 0.0  ;;  %v857_v46 = vadd.f32 %v856_v43, %v767_v42  ;;  %v730_v47 = vpop.f32.mrf.mxu0 }
  0xfa   : > { %v819_v48 = vpop.f32.mrf.mxu1 }
  0xfb   : > { %v1546_v50 = vpack.c.bf16 %v1054_v45, %v1053_v44  ;;  %v1002_v52 = vmul.f32 %v1853_v51, %v857_v46  ;;  %v820_v54 = vadd.f32 %v819_v48, %v730_v47 }
  0xfd   : > { %1606 = vst [vmem:[%s1869_s15 + $0x20] sm:$0xff] %v1546_v50   ;;  %v1038_v53 = vadd.f32 %v1859_v55, %v1002_v52  ;;  %v987_v61 = vmul.f32 %v1853_v51, %v820_v54 }
  0xff   : > { %v1070_v57 = vmax.f32 %v1038_v53, 0.0  ;;  %v770_v58 = vpop.f32.mrf.mxu2  ;;  %v1023_v2 = vadd.f32 %v1859_v55, %v987_v61 }
 0x100   : > { %v859_v59 = vpop.f32.mrf.mxu3 }
 0x101   : > { %v1586_v60 = vpack.c.bf16 %v1070_v57, %v1069_v56  ;;  %v732_v62 = vpop.f32.mrf.mxu0  ;;  %v860_v0 = vadd.f32 %v859_v59, %v770_v58  ;;  %v1055_v8 = vmax.f32 %v1023_v2, 0.0 }
 0x102   : > { %v821_v63 = vpop.f32.mrf.mxu1 }
 0x103   : > { %1614 = vst [vmem:[%s1869_s15 + $0x60] sm:$0xff] %v1586_v60   ;;  %v822_v1 = vadd.f32 %v821_v63, %v732_v62  ;;  %v1003_v4 = vmul.f32 %v1853_v51, %v860_v0 }
 0x105   : > { %v988_v3 = vmul.f32 %v1853_v51, %v822_v1  ;;  %v1039_v13 = vadd.f32 %v1859_v55, %v1003_v4 }
 0x107   : > { %v1024_v5 = vadd.f32 %v1859_v55, %v988_v3  ;;  %v772_v6 = vpop.f32.mrf.mxu2  ;;  %v1071_v18 = vmax.f32 %v1039_v13, 0.0 }
 0x108   : > { %v861_v7 = vpop.f32.mrf.mxu3 }
 0x109   : > { %v1056_v9 = vmax.f32 %v1024_v5, 0.0  ;;  %v862_v10 = vadd.f32 %v861_v7, %v772_v6  ;;  %v735_v11 = vpop.f32.mrf.mxu0 }
 0x10a   : > { %v824_v12 = vpop.f32.mrf.mxu1 }
 0x10b   : > { %v1551_v14 = vpack.c.bf16 %v1056_v9, %v1055_v8  ;;  %v1004_v15 = vmul.f32 %v1853_v51, %v862_v10  ;;  %v825_v17 = vadd.f32 %v824_v12, %v735_v11 }
 0x10d   : > { %1607 = vst [vmem:[%s1869_s15 + $0x28] sm:$0xff] %v1551_v14   ;;  %v1040_v16 = vadd.f32 %v1859_v55, %v1004_v15  ;;  %v989_v23 = vmul.f32 %v1853_v51, %v825_v17 }
 0x10f   : > { %v1072_v19 = vmax.f32 %v1040_v16, 0.0  ;;  %v775_v20 = vpop.f32.mrf.mxu2  ;;  %v1025_v28 = vadd.f32 %v1859_v55, %v989_v23 }
 0x110   : > { %v864_v21 = vpop.f32.mrf.mxu3 }
 0x111   : > { %v1591_v22 = vpack.c.bf16 %v1072_v19, %v1071_v18  ;;  %v737_v24 = vpop.f32.mrf.mxu0  ;;  %v865_v26 = vadd.f32 %v864_v21, %v775_v20  ;;  %v1057_v34 = vmax.f32 %v1025_v28, 0.0 }
 0x112   : > { %v826_v25 = vpop.f32.mrf.mxu1 }
 0x113   : > { %1615 = vst [vmem:[%s1869_s15 + $0x68] sm:$0xff] %v1591_v22   ;;  %v827_v27 = vadd.f32 %v826_v25, %v737_v24  ;;  %v1005_v30 = vmul.f32 %v1853_v51, %v865_v26 }
 0x115   : > { %v990_v29 = vmul.f32 %v1853_v51, %v827_v27  ;;  %v1041_v39 = vadd.f32 %v1859_v55, %v1005_v30 }
 0x117   : > { %v1026_v31 = vadd.f32 %v1859_v55, %v990_v29  ;;  %v777_v32 = vpop.f32.mrf.mxu2  ;;  %v1073_v44 = vmax.f32 %v1041_v39, 0.0 }
 0x118   : > { %v866_v33 = vpop.f32.mrf.mxu3 }
 0x119   : > { %v1058_v35 = vmax.f32 %v1026_v31, 0.0  ;;  %v867_v36 = vadd.f32 %v866_v33, %v777_v32  ;;  %v740_v37 = vpop.f32.mrf.mxu0 }
 0x11a   : > { %v829_v38 = vpop.f32.mrf.mxu1 }
 0x11b   : > { %v1556_v40 = vpack.c.bf16 %v1058_v35, %v1057_v34  ;;  %v1006_v41 = vmul.f32 %v1853_v51, %v867_v36  ;;  %v830_v43 = vadd.f32 %v829_v38, %v740_v37 }
 0x11d   : > { %1608 = vst [vmem:[%s1869_s15 + $0x30] sm:$0xff] %v1556_v40   ;;  %v1042_v42 = vadd.f32 %v1859_v55, %v1006_v41  ;;  %v991_v49 = vmul.f32 %v1853_v51, %v830_v43 }
 0x11f   : > { %v1074_v45 = vmax.f32 %v1042_v42, 0.0  ;;  %v780_v46 = vpop.f32.mrf.mxu2  ;;  %v1027_v56 = vadd.f32 %v1859_v55, %v991_v49 }
 0x120   : > { %v869_v47 = vpop.f32.mrf.mxu3 }
 0x121   : > { %v1596_v48 = vpack.c.bf16 %v1074_v45, %v1073_v44  ;;  %v742_v50 = vpop.f32.mrf.mxu0  ;;  %v870_v53 = vadd.f32 %v869_v47, %v780_v46  ;;  %v1059_v62 = vmax.f32 %v1027_v56, 0.0 }
 0x122   : > { %v831_v52 = vpop.f32.mrf.mxu1 }
 0x123   : > { %1616 = vst [vmem:[%s1869_s15 + $0x70] sm:$0xff] %v1596_v48   ;;  %v832_v54 = vadd.f32 %v831_v52, %v742_v50  ;;  %v1007_v58 = vmul.f32 %v1853_v51, %v870_v53 }
 0x125   : > { %v992_v57 = vmul.f32 %v1853_v51, %v832_v54  ;;  %v1043_v1 = vadd.f32 %v1859_v55, %v1007_v58 }
 0x127   : > { %v1028_v59 = vadd.f32 %v1859_v55, %v992_v57  ;;  %v782_v60 = vpop.f32.mrf.mxu2  ;;  %v1075_v5 = vmax.f32 %v1043_v1, 0.0 }
 0x128   : > { %v871_v61 = vpop.f32.mrf.mxu3 }
 0x129   : > { %v1060_v63 = vmax.f32 %v1028_v59, 0.0  ;;  %v872_v0 = vadd.f32 %v871_v61, %v782_v60 }
 0x12b   : > { %v1561_v2 = vpack.c.bf16 %v1060_v63, %v1059_v62  ;;  %v1008_v3 = vmul.f32 %v1853_v51, %v872_v0 }
 0x12d   : > { %1609 = vst [vmem:[%s1869_s15 + $0x38] sm:$0xff] %v1561_v2   ;;  %v1044_v4 = vadd.f32 %v1859_v55, %v1008_v3 }
 0x12f   : > { %v1076_v6 = vmax.f32 %v1044_v4, 0.0 }
 0x131   : > { %v1601_v7 = vpack.c.bf16 %v1076_v6, %v1075_v5 }
 0x133   : > { %1617 = vst [vmem:[%s1869_s15 + $0x78] sm:$0xff] %v1601_v7  }
 0x134 PF: > { %s14_s17 = sadd.s32 1, %s1682_s17   ;;  %s1960_s15 = smov %s1678_s16 }
 0x135   : > { %p11_p5 = scmp.ge.s32.totalorder %s14_s17, 10   ;;  %s1961_s16 = smov %s1963_s18 }
 0x137   :  { %13 = sbr.rel (!%p11_p5) target bundleno = 2 (0x2), region = 83 }

</bundles_post_ra>
